<compile_context>
chip_gen: v7x
topology: tpu7x:2x2x1
jax: 0.10.0
libtpu: 0.0.40
codegen_flags: <defaults>
</compile_context>

<pallas_src>
import functools

import jax
import jax.numpy as jnp
from jax.experimental import pallas as pl
from jax.experimental.pallas import tpu as pltpu

_LANE = 128


def _sampler_kernel(x_ref, u_ref, out_ref, *, apply_softmax):
    x = x_ref[...].astype(jnp.float32)                        # [bt, Vp]
    bt, vp = x.shape
    n_chunks = vp // _LANE

    if apply_softmax:
        m = jnp.max(x, axis=-1, keepdims=True)                # stable softmax
        x = jnp.exp(x - m)                                    # un-normalized probs
        # padded lanes were filled with -inf in the wrapper -> exp == 0

    total = jnp.sum(x, axis=-1, keepdims=True)                # row mass (softmax denom)
    thresh = u_ref[...] * total                               # [bt, 1]

    # 128x128 upper-triangular ones (k <= j), generated in-kernel: no HBM
    # operand, no extra DMA, constant VMEM footprint independent of V.
    row = jax.lax.broadcasted_iota(jnp.int32, (_LANE, _LANE), 0)
    col = jax.lax.broadcasted_iota(jnp.int32, (_LANE, _LANE), 1)
    tri = (row <= col).astype(jnp.float32)

    # Two-level CDF: per-128-lane-chunk cumsum + running carry across chunks.
    count = jnp.zeros((bt, 1), jnp.int32)
    carry = jnp.zeros((bt, 1), jnp.float32)
    for c in range(n_chunks):                                 # static, unrolled
        xc = x[:, c * _LANE:(c + 1) * _LANE]
        cdf_c = carry + jnp.dot(xc, tri, preferred_element_type=jnp.float32)
        # inverse-CDF, side='right': count buckets whose CDF <= threshold.
        count = count + jnp.sum((cdf_c <= thresh).astype(jnp.int32),
                                axis=-1, keepdims=True)
        carry = carry + jnp.sum(xc, axis=-1, keepdims=True)

    # Never return a zero-probability bucket: clamp to the last index with
    # positive mass (also covers the fp edge where u*total rounds to >= total).
    lane = jax.lax.broadcasted_iota(jnp.int32, (bt, vp), 1)
    last_pos = jnp.max(jnp.where(x > 0.0, lane, -1), axis=-1, keepdims=True)
    out_ref[...] = jnp.minimum(count, jnp.maximum(last_pos, 0))


def sampler(key, logits=None, probabilities=None):
    """JAX/Pallas equivalent of Sampler.forward (randomness from `key`)."""
    if (logits is None) == (probabilities is None):
        raise ValueError('Provide logits or probablities not both')
    apply_softmax = logits is not None
    x = jnp.asarray(logits if apply_softmax else probabilities, jnp.float32)
    B, V = x.shape

    # Pad the category axis to a lane-dense multiple of 128 (padded categories
    # get zero probability and are never selected).
    vp = ((V + _LANE - 1) // _LANE) * _LANE
    if vp != V:
        pad_val = -jnp.inf if apply_softmax else 0.0
        x = jnp.pad(x, ((0, 0), (0, vp - V)), constant_values=pad_val)

    u = jax.random.uniform(key, (B, 1), dtype=jnp.float32)

    # Tile the batch: independent rows -> 'parallel' grid axis (pipelined DMA,
    # and sharded across the 2 TensorCores on v7x when B is large).
    bt = B
    for cand in (1024, 512, 256, 128, 64, 32, 16, 8):
        if B % cand == 0:
            bt = cand
            break
    grid = (B // bt,)

    out = pl.pallas_call(
        functools.partial(_sampler_kernel, apply_softmax=apply_softmax),
        out_shape=jax.ShapeDtypeStruct((B, 1), jnp.int32),
        grid=grid,
        in_specs=[
            pl.BlockSpec((bt, vp), lambda i: (i, 0)),
            pl.BlockSpec((bt, 1), lambda i: (i, 0)),
        ],
        out_specs=pl.BlockSpec((bt, 1), lambda i: (i, 0)),
        compiler_params=pltpu.CompilerParams(
            dimension_semantics=("parallel",)),
    )(x, u)
    return out.reshape(-1)


if __name__ == "__main__":
    key = jax.random.PRNGKey(0)
    k_logits, k_probs, k_u1, k_u2 = jax.random.split(key, 4)

    # Shapes consistent with Chessformer: selectables logits are
    # [batch, board_len] with board_shape=(8, 8) -> board_len = 64.
    B, V = 8, 64

    # Path 1: logits -> softmax -> multinomial(1)
    logits = jax.random.normal(k_logits, (B, V), dtype=jnp.float32)
    samples_from_logits = jax.block_until_ready(sampler(k_u1, logits=logits))
    assert samples_from_logits.shape == (B,)
    assert bool(jnp.all(samples_from_logits >= 0))
    assert bool(jnp.all(samples_from_logits < V))

    # Path 2: probabilities -> multinomial(1)
    probs = jax.nn.softmax(jax.random.normal(k_probs, (B, V)), axis=-1)
    samples_from_probs = jax.block_until_ready(sampler(k_u2, probabilities=probs))
    assert samples_from_probs.shape == (B,)
    assert bool(jnp.all(samples_from_probs >= 0))
    assert bool(jnp.all(samples_from_probs < V))

    # Zero-probability categories must never be sampled (review edge case):
    # a one-hot distribution must always return its single positive index.
    masked = jnp.zeros((B, V), jnp.float32).at[:, 7].set(1.0)
    samples_masked = jax.block_until_ready(sampler(k_u1, probabilities=masked))
    assert bool(jnp.all(samples_masked == 7))

    print("KERNEL_OK")
</pallas_src>

<mosaic_0001>
module attributes {stable_mosaic.version = 11 : i64} {
  func.func @_sampler_kernel(%arg0: i32, %arg1: memref<8x128xf32, #tpu.memory_space<vmem>>, %arg2: memref<8x1xf32, #tpu.memory_space<vmem>>, %arg3: memref<8x1xi32, #tpu.memory_space<vmem>>) attributes {dimension_semantics = [#tpu.dimension_semantics<parallel>], iteration_bounds = array<i64: 1>, scalar_prefetch = 0 : i64, scratch_operands = 0 : i64, tpu.core_type = #tpu.core_type<tc>, window_params = [{transform_indices = @transform_0, window_bounds = array<i64: 8, 128>}, {transform_indices = @transform_1, window_bounds = array<i64: 8, 1>}, {transform_indices = @transform_2, window_bounds = array<i64: 8, 1>}]} {
    %c0 = arith.constant 0 : index
    %c0_0 = arith.constant 0 : index
    %0 = vector.load %arg1[%c0, %c0_0] : memref<8x128xf32, #tpu.memory_space<vmem>>, vector<8x128xf32>
    %cst = arith.constant dense<0xFF800000> : vector<8xf32>
    %1 = vector.multi_reduction <maximumf>, %0, %cst [1] : vector<8x128xf32> to vector<8xf32>
    %2 = vector.shape_cast %1 : vector<8xf32> to vector<8x1xf32>
    %3 = vector.broadcast %2 : vector<8x1xf32> to vector<8x128xf32>
    %4 = arith.subf %0, %3 : vector<8x128xf32>
    %5 = math.exp %4 : vector<8x128xf32>
    %cst_1 = arith.constant dense<0.000000e+00> : vector<8xf32>
    %6 = vector.multi_reduction <add>, %5, %cst_1 [1] : vector<8x128xf32> to vector<8xf32>
    %7 = vector.shape_cast %6 : vector<8xf32> to vector<8x1xf32>
    %c0_2 = arith.constant 0 : index
    %c0_3 = arith.constant 0 : index
    %8 = vector.load %arg2[%c0_2, %c0_3] : memref<8x1xf32, #tpu.memory_space<vmem>>, vector<8x1xf32>
    %9 = arith.mulf %8, %7 : vector<8x1xf32>
    %10 = tpu.iota {dimensions = array<i32: 0>} : vector<128x128xi32>
    %11 = tpu.iota {dimensions = array<i32: 1>} : vector<128x128xi32>
    %12 = arith.cmpi sle, %10, %11 : vector<128x128xi32>
    %13 = arith.extui %12 : vector<128x128xi1> to vector<128x128xi32>
    %14 = arith.sitofp %13 : vector<128x128xi32> to vector<128x128xf32>
    %c0_i32 = arith.constant 0 : i32
    %15 = vector.broadcast %c0_i32 : i32 to vector<8x1xi32>
    %cst_4 = arith.constant 0.000000e+00 : f32
    %16 = vector.broadcast %cst_4 : f32 to vector<8x1xf32>
    %cst_5 = arith.constant dense<0.000000e+00> : vector<8x128xf32>
    %17 = tpu.matmul %5, %14, %cst_5 {dimension_numbers = #tpu.dot_dimension_numbers<[1], [0], [0], [1], [0, 0, 1, 1], [], []>} : vector<8x128xf32>, vector<128x128xf32>, vector<8x128xf32> -> vector<8x128xf32>
    %18 = vector.broadcast %16 : vector<8x1xf32> to vector<8x128xf32>
    %19 = arith.addf %18, %17 : vector<8x128xf32>
    %20 = vector.broadcast %9 : vector<8x1xf32> to vector<8x128xf32>
    %21 = arith.cmpf ole, %19, %20 : vector<8x128xf32>
    %22 = arith.extui %21 : vector<8x128xi1> to vector<8x128xi32>
    %cst_6 = arith.constant dense<0> : vector<8xi32>
    %23 = vector.multi_reduction <add>, %22, %cst_6 [1] : vector<8x128xi32> to vector<8xi32>
    %24 = vector.shape_cast %23 : vector<8xi32> to vector<8x1xi32>
    %25 = arith.addi %15, %24 : vector<8x1xi32>
    %26 = tpu.iota {dimensions = array<i32: 1>} : vector<8x128xi32>
    %cst_7 = arith.constant 0.000000e+00 : f32
    %27 = vector.broadcast %cst_7 : f32 to vector<8x128xf32>
    %28 = arith.cmpf ogt, %5, %27 : vector<8x128xf32>
    %c-1_i32 = arith.constant -1 : i32
    %29 = vector.broadcast %c-1_i32 : i32 to vector<8x128xi32>
    %30 = arith.select %28, %26, %29 : vector<8x128xi1>, vector<8x128xi32>
    %cst_8 = arith.constant dense<-2147483648> : vector<8xi32>
    %31 = vector.multi_reduction <maxsi>, %30, %cst_8 [1] : vector<8x128xi32> to vector<8xi32>
    %32 = vector.shape_cast %31 : vector<8xi32> to vector<8x1xi32>
    %c0_i32_9 = arith.constant 0 : i32
    %33 = vector.broadcast %c0_i32_9 : i32 to vector<8x1xi32>
    %34 = arith.maxsi %32, %33 : vector<8x1xi32>
    %35 = arith.minsi %25, %34 : vector<8x1xi32>
    %c0_10 = arith.constant 0 : index
    %c0_11 = arith.constant 0 : index
    %36 = vector.load %arg3[%c0_10, %c0_11] : memref<8x1xi32, #tpu.memory_space<vmem>>, vector<8x1xi32>
    tpu.vector_store %arg3[%c0_10, %c0_11], %35 {strides = array<i32>} : memref<8x1xi32, #tpu.memory_space<vmem>>, vector<8x1xi32>,
    return
  }
  func.func @transform_0(%arg0: i32) -> (i32, i32) {
    %c0_i32 = arith.constant 0 : i32
    %c0_i32_0 = arith.constant 0 : i32
    return %arg0, %c0_i32 : i32, i32
  }
  func.func @transform_1(%arg0: i32) -> (i32, i32) {
    %c0_i32 = arith.constant 0 : i32
    %c0_i32_0 = arith.constant 0 : i32
    return %arg0, %c0_i32 : i32, i32
  }
  func.func @transform_2(%arg0: i32) -> (i32, i32) {
    %c0_i32 = arith.constant 0 : i32
    %c0_i32_0 = arith.constant 0 : i32
    return %arg0, %c0_i32 : i32, i32
  }
}

</mosaic_0001>

<bundles_post_ra>
// kernel: tpu_custom_call.1
= control target key start
LH: loop header
LB: loop body
LE: loop exit
PB: predicated region body
PF: predicated region fallthrough
CT: control target
= control target key end

     0   :  { %v21_v0 = vlaneseq  ;;  %v320_v2 = vmov 0.0|0.0   ;;  %v321_v10 = vmov 1.0|1.0   ;;  %v323_v19 = vmov 0.0   ;;  %s372_s0 = inlined_call_operand.vmem [shape: f32[8,128], index: 0, kind: input, shape index: {}]   ;;  %s373_s1 = inlined_call_operand.vmem [shape: f32[8,1], index: 1, kind: input, shape index: {}]   ;;  %s374_s2 = inlined_call_operand.vmem [shape: s32[8,1], index: 2, kind: output, shape index: {}]  }
   0x1   :  { %v343_v1 = vld [vmem:[%s372_s0] sm:$0xff]  ;;  %287 = vmatprep.subr.bf16.mxu0 %v320_v2  ;;  %v324_v29 = vmov 0  }
   0x2   :  { %12 = vmax.xlane.f32.xlu0 %v343_v1  ;;  %v22_v3 = vshrl.u32 %v21_v0, 7  ;;  %v346_v4 = vand.u32 127, %v21_v0  ;;  %316 = vset.pattern.permute.xlu1 %v324_v29  ;;  %v19_v30 = vld [vmem:[%s373_s1] sm:$0xff] }
   0x3   :  { %317 = vset.pattern.permute.xlu0 %v324_v29 }
   0x4   :  { %v23_v5 = vadd.s32 8, %v22_v3  ;;  %vm40_vm0 = vcmp.le.s32.totalorder %v22_v3, %v346_v4  ;;  %v24_v6 = vadd.s32 16, %v22_v3  ;;  %v25_v7 = vadd.s32 24, %v22_v3 }
   0x5   :  { %v26_v8 = vadd.s32 32, %v22_v3  ;;  %v27_v9 = vadd.s32 40, %v22_v3  ;;  %v28_v11 = vadd.s32 48, %v22_v3  ;;  %v29_v12 = vadd.s32 56, %v22_v3 }
   0x6   :  { %vm41_vm1 = vcmp.le.s32.totalorder %v23_v5, %v346_v4  ;;  %vm42_vm2 = vcmp.le.s32.totalorder %v24_v6, %v346_v4  ;;  %vm43_vm3 = vcmp.le.s32.totalorder %v25_v7, %v346_v4  ;;  %v30_v13 = vadd.s32 64, %v22_v3 }
   0x7   :  { %vm288_vm4 = vmpackc.low %vm41_vm1, %vm40_vm0  ;;  %vm44_vm6 = vcmp.le.s32.totalorder %v26_v8, %v346_v4  ;;  %vm45_vm7 = vcmp.le.s32.totalorder %v27_v9, %v346_v4  ;;  %vm46_vm9 = vcmp.le.s32.totalorder %v28_v11, %v346_v4  ;;  %vm47_vm10 = vcmp.le.s32.totalorder %v29_v12, %v346_v4 }
   0x8   :  { %289 = vmatpush3.bf16.msk.msra.mxu0 %vm288_vm4, %v321_v10  ;;  %vm291_vm5 = vmpackc.low %vm43_vm3, %vm42_vm2  ;;  %v31_v14 = vadd.s32 72, %v22_v3  ;;  %vm48_vm12 = vcmp.le.s32.totalorder %v30_v13, %v346_v4  ;;  %v32_v15 = vadd.s32 80, %v22_v3  ;;  %v33_v16 = vadd.s32 88, %v22_v3 }
   0x9   :  { %290 = vmatprep.subr.bf16.mxu0 %v320_v2  ;;  %vm294_vm8 = vmpackc.low %vm45_vm7, %vm44_vm6  ;;  %v34_v17 = vadd.s32 96, %v22_v3  ;;  %v35_v18 = vadd.s32 104, %v22_v3  ;;  %vm322_vm1 = vmmov 0   ;;  %v36_v20 = vadd.s32 112, %v22_v3 }
   0xa   :  { %vm297_vm11 = vmpackc.low %vm47_vm10, %vm46_vm9  ;;  %vm49_vm13 = vcmp.le.s32.totalorder %v31_v14, %v346_v4  ;;  %vm50_vm15 = vcmp.le.s32.totalorder %v32_v15, %v346_v4  ;;  %vm51_vm0 = vcmp.le.s32.totalorder %v33_v16, %v346_v4  ;;  %284 = vmatprep.mubr.msk.f32.mxu0 %vm322_vm1, %v323_v19  ;;  %v37_v21 = vadd.s32 120, %v22_v3 }
   0xb   :  { %vm300_vm14 = vmpackc.low %vm49_vm13, %vm48_vm12  ;;  %vm52_vm3 = vcmp.le.s32.totalorder %v34_v17, %v346_v4  ;;  %vm53_vm4 = vcmp.le.s32.totalorder %v35_v18, %v346_v4  ;;  %vm54_vm6 = vcmp.le.s32.totalorder %v36_v20, %v346_v4  ;;  %vm197_vm13 = vcmask 7168  }
   0xc   :  { %292 = vmatpush3.bf16.msk.msra.mxu0 %vm291_vm5, %v321_v10  ;;  %vm303_vm2 = vmpackc.low %vm51_vm0, %vm50_vm15  ;;  %vm55_vm7 = vcmp.le.s32.totalorder %v37_v21, %v346_v4 }
   0xd   :  { %293 = vmatprep.subr.bf16.mxu0 %v320_v2  ;;  %vm306_vm5 = vmpackc.low %vm53_vm4, %vm52_vm3 }
  0x10   :  { %295 = vmatpush3.bf16.msk.msra.mxu0 %vm294_vm8, %v321_v10  ;;  %vm309_vm8 = vmpackc.low %vm55_vm7, %vm54_vm6 }
  0x11   :  { %296 = vmatprep.subr.bf16.mxu0 %v320_v2 }
  0x14   :  { %298 = vmatpush3.bf16.msk.msra.mxu0 %vm297_vm11, %v321_v10 }
  0x15   :  { %299 = vmatprep.subr.bf16.mxu0 %v320_v2 }
  0x18   :  { %301 = vmatpush3.bf16.msk.msra.mxu0 %vm300_vm14, %v321_v10 }
  0x19   :  { %302 = vmatprep.subr.bf16.mxu0 %v320_v2 }
  0x1c   :  { %304 = vmatpush3.bf16.msk.msra.mxu0 %vm303_vm2, %v321_v10 }
  0x1d   :  { %305 = vmatprep.subr.bf16.mxu0 %v320_v2 }
  0x20   :  { %307 = vmatpush3.bf16.msk.msra.mxu0 %vm306_vm5, %v321_v10 }
  0x21   :  { %308 = vmatprep.subr.bf16.mxu0 %v320_v2 }
  0x24   :  { %310 = vmatpush3.bf16.msk.msra.mxu0 %vm309_vm8, %v321_v10 }
  0x8f   :  { %v13_v22 = vpop.xlane.xlu0 %12 }
  0x90   :  { %v14_v23 = vsub.f32 %v343_v1, %v13_v22 }
  0x92   :  { %v15_v24 = vmul.f32 1.442695, %v14_v23 }
  0x94   :  { %318 = vpow2.f32 %v15_v24 }
  0x9e   :  { %v319_v25 = vpop.eup %318 }
  0x9f   :  { %17 = vadd.xlane.f32.xlu0 %v319_v25  ;;  %285 = vmatmul.mubr.f32.vlgmr.msra.gmra.mrb[0].mxu0 %v319_v25  ;;  %vm177_vm9 = vcmp.gt.f32.partialorder %v319_v25, 0.0 }
  0xa0   :  { %v178_v26 = vsel %vm177_vm9, %v346_v4, 4294967295 }
  0xa1   :  { %v180_v27 = vshra.s32 %v178_v26, 16  ;;  %v179_v33 = vand.u32 65535, %v178_v26 }
  0xa3   :  { %v182_v28 = vcvt.s32.f32 %v180_v27  ;;  %v181_v35 = vcvt.s32.f32 %v179_v33 }
  0xa5   :  { %183 = vmax.xlane.f32.xlu1 %v182_v28 }
 0x12c   :  { %v18_v31 = vpop.xlane.xlu0 %17 }
 0x12d   :  { %v20_v32 = vmul.f32 %v19_v30, %v18_v31 }
 0x12f   :  { %160 = vperm.xlu1 %316, %v20_v32  }
 0x132   :  { %v184_v34 = vpop.xlane.xlu1 %183 }
 0x133   :  { %vm185_vm10 = vcmp.eq.f32.partialorder %v182_v28, %v184_v34  ;;  %v190_v46 = vcvt.f32.s32 %v184_v34 }
 0x134   :  { %v186_v36 = vsel %vm185_vm10, %v181_v35, -inf }
 0x135   :  { %187 = vmax.xlane.f32.xlu0 %v186_v36  ;;  %v191_v48 = vshll.u32 %v190_v46, 16 }
 0x172   :  { %v154_v37 = vpop.f32.mrb[0].mxu0 }
 0x173   :  { %v286_v38 = vpop.f32.mrb[1].mxu0 }
 0x1ae   :  { %v161_v39 = vpop.permute.xlu1 %160 }
 0x1af   :  { %vm163_vm11 = vcmp.le.f32.partialorder %v154_v37, %v161_v39 }
 0x1b0   :  { %v164_v40 = vsel %vm163_vm11, 1, %v324_v29 }
 0x1b1   :  { %v166_v41 = vshrl.u32 %v164_v40, 16  ;;  %v165_v43 = vand.u32 65535, %v164_v40 }
 0x1b3   :  { %v168_v42 = vcvt.s32.f32 %v166_v41  ;;  %v167_v44 = vcvt.s32.f32 %v165_v43 }
 0x1b5   :  { %171 = vadd.xlane.f32.xlu0 %v168_v42 }
 0x1b9   :  { %169 = vadd.xlane.f32.xlu0 %v167_v44 }
 0x1c2   :  { %v188_v45 = vpop.xlane.xlu0 %187 }
 0x1c3   :  { %v189_v47 = vcvt.f32.s32 %v188_v45 }
 0x1c5   :  { %v192_v50 = vadd.s32 %v191_v48, %v189_v47 }
 0x1c7   :  { %vm193_vm12 = vcmp.gt.s32.totalorder %v192_v50, 0 }
 0x1c8   :  { %v194_v56 = vsel %vm193_vm12, %v192_v50, 0 }
 0x242   :  { %v172_v49 = vpop.xlane.xlu0 %171 }
 0x243   :  { %v174_v51 = vcvt.f32.s32 %v172_v49 }
 0x245   :  { %v175_v53 = vshll.u32 %v174_v51, 16 }
 0x246   :  { %v170_v52 = vpop.xlane.xlu0 %169 }
 0x247   :  { %v173_v54 = vcvt.f32.s32 %v170_v52 }
 0x249   :  { %v176_v55 = vadd.s32 %v175_v53, %v173_v54 }
 0x24b   :  { %vm195_vm14 = vcmp.lt.s32.totalorder %v176_v55, %v194_v56 }
 0x24c   :  { %v196_v57 = vsel %vm195_vm14, %v176_v55, %v194_v56 }
 0x24d   :  { %198 = vst.msk [vmem:[%s374_s2] sm:$0xff] %vm197_vm13, %v196_v57 }

</bundles_post_ra>
